<compile_context>
chip_gen: v7x
topology: tpu7x:2x2x1
jax: 0.10.0
libtpu: 0.0.40
codegen_flags: <defaults>
</compile_context>

<pallas_src>
import jax
import jax.numpy as jnp
from jax.experimental import pallas as pl
from jax.experimental.pallas import tpu as pltpu


def decoder_kernel(enc_flat_ref, emb_ref, h_ref, c_ref,
                   weh_ref, wee_ref, be_ref,
                   wih_ctx_ref, wih_emb_ref, whh_ref, blstm_ref,
                   wfc_ref, bfc_ref,
                   pred_ref, hout_ref, cout_ref):
    N, H = h_ref.shape
    SN, H2 = enc_flat_ref.shape          # (S*N, 2H)
    S = SN // N

    enc_flat = enc_flat_ref[...]         # (S*N, 2H) bf16
    emb = emb_ref[...]                   # (N, E)    bf16
    h = h_ref[...]                       # (N, H)    f32
    c = c_ref[...]                       # (N, H)    f32
    h_bf = h.astype(jnp.bfloat16)

    # ---- attention energy: relu(Linear_{3H->1}(cat(h_rep, enc))) ----------
    # single 2-D MXU matmul instead of S tiny batched matmuls
    e_flat = jnp.dot(enc_flat, wee_ref[...],
                     preferred_element_type=jnp.float32)           # (S*N, 1) f32
    h_part = jnp.dot(h_bf, weh_ref[...],
                     preferred_element_type=jnp.float32)           # (N, 1)   f32
    energy = jnp.maximum(
        e_flat.reshape(S, N, 1) + h_part[None, :, :] + be_ref[0], 0.0)  # (S, N, 1)

    # ---- softmax over the sequence axis (dim=0) ----------------------------
    m = jnp.max(energy, axis=0, keepdims=True)
    p = jnp.exp(energy - m)
    attn = p * pl.reciprocal(jnp.sum(p, axis=0, keepdims=True), approx=True)  # (S,N,1)

    # ---- context vector: sum_s attn[s,n] * enc[s,n,:] -----------------------
    weighted = attn.reshape(SN, 1) * enc_flat                      # (S*N, 2H) f32
    ctx = jnp.sum(weighted.reshape(S, N, H2), axis=0)              # (N, 2H)   f32

    # ---- single-step LSTM (concat eliminated: split input matmul) ----------
    gates = (jnp.dot(ctx.astype(jnp.bfloat16), wih_ctx_ref[...],
                     preferred_element_type=jnp.float32)
             + jnp.dot(emb, wih_emb_ref[...],
                       preferred_element_type=jnp.float32)
             + jnp.dot(h_bf, whh_ref[...],
                       preferred_element_type=jnp.float32)
             + blstm_ref[...])                                     # (N, 4H) f32
    i = jax.nn.sigmoid(gates[:, 0 * H:1 * H])
    f = jax.nn.sigmoid(gates[:, 1 * H:2 * H])
    g = jnp.tanh(gates[:, 2 * H:3 * H])
    o = jax.nn.sigmoid(gates[:, 3 * H:4 * H])
    c_new = f * c + i * g
    h_new = o * jnp.tanh(c_new)

    hout_ref[...] = h_new
    cout_ref[...] = c_new

    # ---- output projection (lane-dense padded output slab) -----------------
    pred_ref[...] = (jnp.dot(h_new.astype(jnp.bfloat16), wfc_ref[...],
                             preferred_element_type=jnp.float32)
                     + bfc_ref[...])


def _decoder_forward(params, x, encoder_states, hidden, cell):
    S, N, H2 = encoder_states.shape
    H = H2 // 2
    E = params['emb'].shape[1]
    O = params['fc_w'].shape[1]
    O_pad = ((O + 127) // 128) * 128

    # glue: embedding lookup (gather) + dropout(eval) = identity
    emb = jnp.take(params['emb'], x, axis=0).astype(jnp.bfloat16)   # (N, E)
    h0 = hidden[0].astype(jnp.float32)                              # (N, H)
    c0 = cell[0].astype(jnp.float32)                                # (N, H)

    # encoder states: bf16 (halves HBM->VMEM bytes), pre-flattened in HBM (free)
    enc_flat = encoder_states.astype(jnp.bfloat16).reshape(S * N, H2)

    # energy weights split so the kernel avoids lane/sublane slicing of (3H,1)
    weh = params['energy_w'][:H].astype(jnp.bfloat16)               # (H, 1)
    wee = params['energy_w'][H:].astype(jnp.bfloat16)               # (2H, 1)
    be = params['energy_b'].reshape(1).astype(jnp.float32)          # (1,)  -> SMEM

    # LSTM input weights split (context part / embedding part) -> no concat
    wih_ctx = params['w_ih'][:H2].astype(jnp.bfloat16)              # (2H, 4H)
    wih_emb = params['w_ih'][H2:].astype(jnp.bfloat16)              # (E, 4H)
    whh = params['w_hh'].astype(jnp.bfloat16)                       # (H, 4H)
    blstm = params['b_lstm'].astype(jnp.float32)                    # (1, 4H)

    # fc: pad O up to a lane-dense multiple of 128, slice back outside
    wfc_pad = jnp.zeros((H, O_pad), jnp.bfloat16).at[:, :O].set(
        params['fc_w'].astype(jnp.bfloat16))
    bfc_pad = jnp.zeros((1, O_pad), jnp.float32).at[:, :O].set(
        params['fc_b'].astype(jnp.float32))

    vspec = pl.BlockSpec(memory_space=pltpu.MemorySpace.VMEM)
    sspec = pl.BlockSpec(memory_space=pltpu.MemorySpace.SMEM)

    pred_pad, h_new, c_new = pl.pallas_call(
        decoder_kernel,
        out_shape=(
            jax.ShapeDtypeStruct((N, O_pad), jnp.float32),
            jax.ShapeDtypeStruct((N, H), jnp.float32),
            jax.ShapeDtypeStruct((N, H), jnp.float32),
        ),
        in_specs=[vspec, vspec, vspec, vspec,   # enc_flat, emb, h0, c0
                  vspec, vspec, sspec,          # weh, wee, be (SMEM scalar)
                  vspec, vspec, vspec, vspec,   # wih_ctx, wih_emb, whh, blstm
                  vspec, vspec],                # wfc_pad, bfc_pad
        out_specs=(vspec, vspec, vspec),
        input_output_aliases={2: 1, 3: 2},      # h0 -> h_new, c0 -> c_new in place
    )(enc_flat, emb, h0, c0, weh, wee, be,
      wih_ctx, wih_emb, whh, blstm, wfc_pad, bfc_pad)

    return pred_pad[:, :O], h_new[None, :, :], c_new[None, :, :]


decoder_forward = jax.jit(_decoder_forward)


def init_params(key, input_size, embedding_dim, hidden_size, output_size):
    H, E, O, V = hidden_size, embedding_dim, output_size, input_size
    ks = jax.random.split(key, 8)
    u = lambda k, shape, bound: jax.random.uniform(k, shape, jnp.float32, -bound, bound)
    lstm_in = 2 * H + E
    return {
        'emb':      jax.random.normal(ks[0], (V, E), jnp.float32),
        # energy: Linear(3H -> 1); stored transposed (3H, 1)
        'energy_w': u(ks[1], (3 * H, 1), 1.0 / (3 * H) ** 0.5),
        'energy_b': u(ks[2], (1, 1), 1.0 / (3 * H) ** 0.5),
        # LSTM: W_ih (2H+E, 4H), W_hh (H, 4H) stored transposed; b = b_ih + b_hh
        'w_ih':     u(ks[3], (lstm_in, 4 * H), 1.0 / H ** 0.5),
        'w_hh':     u(ks[4], (H, 4 * H), 1.0 / H ** 0.5),
        'b_lstm':   u(ks[5], (1, 4 * H), 1.0 / H ** 0.5),
        # fc: Linear(H -> O) stored transposed
        'fc_w':     u(ks[6], (H, O), 1.0 / H ** 0.5),
        'fc_b':     u(ks[7], (1, O), 1.0 / H ** 0.5),
    }


if __name__ == "__main__":
    # small shapes: vocab=32, embed=16, hidden=32, output=16, seq=8, batch=8
    V, E, H, O = 32, 16, 32, 16
    S, N = 8, 8

    key = jax.random.PRNGKey(0)
    kp, kx, ke, kh, kc = jax.random.split(key, 5)

    params = init_params(kp, V, E, H, O)
    x = jax.random.randint(kx, (N,), 0, V, dtype=jnp.int32)
    encoder_states = jax.random.normal(ke, (S, N, 2 * H), jnp.float32)
    hidden = jax.random.normal(kh, (1, N, H), jnp.float32)
    cell = jax.random.normal(kc, (1, N, H), jnp.float32)

    pred, h_new, c_new = decoder_forward(params, x, encoder_states, hidden, cell)
    jax.block_until_ready((pred, h_new, c_new))

    assert pred.shape == (N, O)
    assert h_new.shape == (1, N, H)
    assert c_new.shape == (1, N, H)
    assert bool(jnp.all(jnp.isfinite(pred)))
    assert bool(jnp.all(jnp.isfinite(h_new)))
    assert bool(jnp.all(jnp.isfinite(c_new)))
    print("KERNEL_OK")
</pallas_src>

<mosaic_0001>
module attributes {stable_mosaic.version = 11 : i64} {
  func.func @decoder_kernel(%arg0: memref<64x64xbf16, #tpu.memory_space<vmem>>, %arg1: memref<8x16xbf16, #tpu.memory_space<vmem>>, %arg2: memref<8x32xf32, #tpu.memory_space<vmem>>, %arg3: memref<8x32xf32, #tpu.memory_space<vmem>>, %arg4: memref<32x1xbf16, #tpu.memory_space<vmem>>, %arg5: memref<64x1xbf16, #tpu.memory_space<vmem>>, %arg6: memref<1xf32, #tpu.memory_space<smem>>, %arg7: memref<64x128xbf16, #tpu.memory_space<vmem>>, %arg8: memref<16x128xbf16, #tpu.memory_space<vmem>>, %arg9: memref<32x128xbf16, #tpu.memory_space<vmem>>, %arg10: memref<1x128xf32, #tpu.memory_space<vmem>>, %arg11: memref<32x128xbf16, #tpu.memory_space<vmem>>, %arg12: memref<1x128xf32, #tpu.memory_space<vmem>>, %arg13: memref<8x128xf32, #tpu.memory_space<vmem>>, %arg14: memref<8x32xf32, #tpu.memory_space<vmem>>, %arg15: memref<8x32xf32, #tpu.memory_space<vmem>>) attributes {dimension_semantics = [], scalar_prefetch = 0 : i64, scratch_operands = 0 : i64, tpu.core_type = #tpu.core_type<tc>} {
    %c0 = arith.constant 0 : index
    %c0_0 = arith.constant 0 : index
    %0 = vector.load %arg0[%c0, %c0_0] : memref<64x64xbf16, #tpu.memory_space<vmem>>, vector<64x64xbf16>
    %c0_1 = arith.constant 0 : index
    %c0_2 = arith.constant 0 : index
    %1 = vector.load %arg1[%c0_1, %c0_2] : memref<8x16xbf16, #tpu.memory_space<vmem>>, vector<8x16xbf16>
    %c0_3 = arith.constant 0 : index
    %c0_4 = arith.constant 0 : index
    %2 = vector.load %arg2[%c0_3, %c0_4] : memref<8x32xf32, #tpu.memory_space<vmem>>, vector<8x32xf32>
    %c0_5 = arith.constant 0 : index
    %c0_6 = arith.constant 0 : index
    %3 = vector.load %arg3[%c0_5, %c0_6] : memref<8x32xf32, #tpu.memory_space<vmem>>, vector<8x32xf32>
    %4 = arith.truncf %2 : vector<8x32xf32> to vector<8x32xbf16>
    %c0_7 = arith.constant 0 : index
    %c0_8 = arith.constant 0 : index
    %5 = vector.load %arg5[%c0_7, %c0_8] : memref<64x1xbf16, #tpu.memory_space<vmem>>, vector<64x1xbf16>
    %cst = arith.constant dense<0.000000e+00> : vector<64x1xf32>
    %6 = tpu.matmul %0, %5, %cst {dimension_numbers = #tpu.dot_dimension_numbers<[1], [0], [0], [1], [0, 0, 1, 1], [], []>} : vector<64x64xbf16>, vector<64x1xbf16>, vector<64x1xf32> -> vector<64x1xf32>
    %c0_9 = arith.constant 0 : index
    %c0_10 = arith.constant 0 : index
    %7 = vector.load %arg4[%c0_9, %c0_10] : memref<32x1xbf16, #tpu.memory_space<vmem>>, vector<32x1xbf16>
    %cst_11 = arith.constant dense<0.000000e+00> : vector<8x1xf32>
    %8 = tpu.matmul %4, %7, %cst_11 {dimension_numbers = #tpu.dot_dimension_numbers<[1], [0], [0], [1], [0, 0, 1, 1], [], []>} : vector<8x32xbf16>, vector<32x1xbf16>, vector<8x1xf32> -> vector<8x1xf32>
    %9 = vector.shape_cast %6 : vector<64x1xf32> to vector<8x8x1xf32>
    %10 = vector.shape_cast %8 : vector<8x1xf32> to vector<1x8x1xf32>
    %11 = vector.broadcast %10 : vector<1x8x1xf32> to vector<8x8x1xf32>
    %12 = arith.addf %9, %11 : vector<8x8x1xf32>
    %c0_12 = arith.constant 0 : index
    %13 = memref.load %arg6[%c0_12] : memref<1xf32, #tpu.memory_space<smem>>
    %14 = vector.broadcast %13 : f32 to vector<8x8x1xf32>
    %15 = arith.addf %12, %14 : vector<8x8x1xf32>
    %cst_13 = arith.constant 0.000000e+00 : f32
    %16 = vector.broadcast %cst_13 : f32 to vector<8x8x1xf32>
    %17 = arith.maximumf %15, %16 : vector<8x8x1xf32>
    %cst_14 = arith.constant dense<0xFF800000> : vector<8x1xf32>
    %18 = vector.multi_reduction <maximumf>, %17, %cst_14 [0] : vector<8x8x1xf32> to vector<8x1xf32>
    %19 = vector.shape_cast %18 : vector<8x1xf32> to vector<1x8x1xf32>
    %20 = vector.broadcast %19 : vector<1x8x1xf32> to vector<8x8x1xf32>
    %21 = arith.subf %17, %20 : vector<8x8x1xf32>
    %22 = math.exp %21 : vector<8x8x1xf32>
    %cst_15 = arith.constant dense<0.000000e+00> : vector<8x1xf32>
    %23 = vector.multi_reduction <add>, %22, %cst_15 [0] : vector<8x8x1xf32> to vector<8x1xf32>
    %24 = vector.shape_cast %23 : vector<8x1xf32> to vector<1x8x1xf32>
    %25 = tpu.reciprocal %24 {approx = true} : vector<1x8x1xf32> -> vector<1x8x1xf32>
    %26 = vector.broadcast %25 : vector<1x8x1xf32> to vector<8x8x1xf32>
    %27 = arith.mulf %22, %26 : vector<8x8x1xf32>
    %28 = vector.shape_cast %27 : vector<8x8x1xf32> to vector<64x1xf32>
    %29 = arith.extf %0 : vector<64x64xbf16> to vector<64x64xf32>
    %30 = vector.broadcast %28 : vector<64x1xf32> to vector<64x64xf32>
    %31 = arith.mulf %30, %29 : vector<64x64xf32>
    %32 = vector.shape_cast %31 : vector<64x64xf32> to vector<8x8x64xf32>
    %cst_16 = arith.constant dense<0.000000e+00> : vector<8x64xf32>
    %33 = vector.multi_reduction <add>, %32, %cst_16 [0] : vector<8x8x64xf32> to vector<8x64xf32>
    %34 = arith.truncf %33 : vector<8x64xf32> to vector<8x64xbf16>
    %c0_17 = arith.constant 0 : index
    %c0_18 = arith.constant 0 : index
    %35 = vector.load %arg7[%c0_17, %c0_18] : memref<64x128xbf16, #tpu.memory_space<vmem>>, vector<64x128xbf16>
    %cst_19 = arith.constant dense<0.000000e+00> : vector<8x128xf32>
    %36 = tpu.matmul %34, %35, %cst_19 {dimension_numbers = #tpu.dot_dimension_numbers<[1], [0], [0], [1], [0, 0, 1, 1], [], []>} : vector<8x64xbf16>, vector<64x128xbf16>, vector<8x128xf32> -> vector<8x128xf32>
    %c0_20 = arith.constant 0 : index
    %c0_21 = arith.constant 0 : index
    %37 = vector.load %arg8[%c0_20, %c0_21] : memref<16x128xbf16, #tpu.memory_space<vmem>>, vector<16x128xbf16>
    %cst_22 = arith.constant dense<0.000000e+00> : vector<8x128xf32>
    %38 = tpu.matmul %1, %37, %cst_22 {dimension_numbers = #tpu.dot_dimension_numbers<[1], [0], [0], [1], [0, 0, 1, 1], [], []>} : vector<8x16xbf16>, vector<16x128xbf16>, vector<8x128xf32> -> vector<8x128xf32>
    %39 = arith.addf %36, %38 : vector<8x128xf32>
    %c0_23 = arith.constant 0 : index
    %c0_24 = arith.constant 0 : index
    %40 = vector.load %arg9[%c0_23, %c0_24] : memref<32x128xbf16, #tpu.memory_space<vmem>>, vector<32x128xbf16>
    %cst_25 = arith.constant dense<0.000000e+00> : vector<8x128xf32>
    %41 = tpu.matmul %4, %40, %cst_25 {dimension_numbers = #tpu.dot_dimension_numbers<[1], [0], [0], [1], [0, 0, 1, 1], [], []>} : vector<8x32xbf16>, vector<32x128xbf16>, vector<8x128xf32> -> vector<8x128xf32>
    %42 = arith.addf %39, %41 : vector<8x128xf32>
    %c0_26 = arith.constant 0 : index
    %c0_27 = arith.constant 0 : index
    %43 = vector.load %arg10[%c0_26, %c0_27] : memref<1x128xf32, #tpu.memory_space<vmem>>, vector<1x128xf32>
    %44 = vector.broadcast %43 : vector<1x128xf32> to vector<8x128xf32>
    %45 = arith.addf %42, %44 : vector<8x128xf32>
    %46 = vector.extract_strided_slice %45 {offsets = [0, 0], sizes = [8, 32], strides = [1, 1]} : vector<8x128xf32> to vector<8x32xf32>
    %47 = arith.negf %46 : vector<8x32xf32>
    %48 = math.exp %47 : vector<8x32xf32>
    %cst_28 = arith.constant 1.000000e+00 : f32
    %49 = vector.broadcast %cst_28 : f32 to vector<8x32xf32>
    %50 = arith.addf %49, %48 : vector<8x32xf32>
    %51 = arith.divf %49, %50 : vector<8x32xf32>
    %52 = vector.extract_strided_slice %45 {offsets = [0, 32], sizes = [8, 32], strides = [1, 1]} : vector<8x128xf32> to vector<8x32xf32>
    %53 = arith.negf %52 : vector<8x32xf32>
    %54 = math.exp %53 : vector<8x32xf32>
    %cst_29 = arith.constant 1.000000e+00 : f32
    %55 = vector.broadcast %cst_29 : f32 to vector<8x32xf32>
    %56 = arith.addf %55, %54 : vector<8x32xf32>
    %57 = arith.divf %55, %56 : vector<8x32xf32>
    %58 = vector.extract_strided_slice %45 {offsets = [0, 64], sizes = [8, 32], strides = [1, 1]} : vector<8x128xf32> to vector<8x32xf32>
    %59 = math.tanh %58 : vector<8x32xf32>
    %60 = vector.extract_strided_slice %45 {offsets = [0, 96], sizes = [8, 32], strides = [1, 1]} : vector<8x128xf32> to vector<8x32xf32>
    %61 = arith.negf %60 : vector<8x32xf32>
    %62 = math.exp %61 : vector<8x32xf32>
    %cst_30 = arith.constant 1.000000e+00 : f32
    %63 = vector.broadcast %cst_30 : f32 to vector<8x32xf32>
    %64 = arith.addf %63, %62 : vector<8x32xf32>
    %65 = arith.divf %63, %64 : vector<8x32xf32>
    %66 = arith.mulf %57, %3 : vector<8x32xf32>
    %67 = arith.mulf %51, %59 : vector<8x32xf32>
    %68 = arith.addf %66, %67 : vector<8x32xf32>
    %69 = math.tanh %68 : vector<8x32xf32>
    %70 = arith.mulf %65, %69 : vector<8x32xf32>
    %c0_31 = arith.constant 0 : index
    %c0_32 = arith.constant 0 : index
    %71 = vector.load %arg14[%c0_31, %c0_32] : memref<8x32xf32, #tpu.memory_space<vmem>>, vector<8x32xf32>
    tpu.vector_store %arg14[%c0_31, %c0_32], %70 {strides = array<i32>} : memref<8x32xf32, #tpu.memory_space<vmem>>, vector<8x32xf32>,
    %c0_33 = arith.constant 0 : index
    %c0_34 = arith.constant 0 : index
    %72 = vector.load %arg15[%c0_33, %c0_34] : memref<8x32xf32, #tpu.memory_space<vmem>>, vector<8x32xf32>
    tpu.vector_store %arg15[%c0_33, %c0_34], %68 {strides = array<i32>} : memref<8x32xf32, #tpu.memory_space<vmem>>, vector<8x32xf32>,
    %73 = arith.truncf %70 : vector<8x32xf32> to vector<8x32xbf16>
    %c0_35 = arith.constant 0 : index
    %c0_36 = arith.constant 0 : index
    %74 = vector.load %arg11[%c0_35, %c0_36] : memref<32x128xbf16, #tpu.memory_space<vmem>>, vector<32x128xbf16>
    %cst_37 = arith.constant dense<0.000000e+00> : vector<8x128xf32>
    %75 = tpu.matmul %73, %74, %cst_37 {dimension_numbers = #tpu.dot_dimension_numbers<[1], [0], [0], [1], [0, 0, 1, 1], [], []>} : vector<8x32xbf16>, vector<32x128xbf16>, vector<8x128xf32> -> vector<8x128xf32>
    %c0_38 = arith.constant 0 : index
    %c0_39 = arith.constant 0 : index
    %76 = vector.load %arg12[%c0_38, %c0_39] : memref<1x128xf32, #tpu.memory_space<vmem>>, vector<1x128xf32>
    %77 = vector.broadcast %76 : vector<1x128xf32> to vector<8x128xf32>
    %78 = arith.addf %75, %77 : vector<8x128xf32>
    %c0_40 = arith.constant 0 : index
    %c0_41 = arith.constant 0 : index
    %79 = vector.load %arg13[%c0_40, %c0_41] : memref<8x128xf32, #tpu.memory_space<vmem>>, vector<8x128xf32>
    tpu.vector_store %arg13[%c0_40, %c0_41], %78 {strides = array<i32>} : memref<8x128xf32, #tpu.memory_space<vmem>>, vector<8x128xf32>,
    return
  }
}

</mosaic_0001>

<bundles_post_ra>
// kernel: _decoder_forward.1
= control target key start
LH: loop header
LB: loop body
LE: loop exit
PB: predicated region body
PF: predicated region fallthrough
CT: control target
= control target key end

     0   :  { %v932_v2 = vmov 0.0   ;;  %vm933_vm0 = vmmov 0   ;;  %vm114_vm1 = vcmask 523264   ;;  %vm208_vm2 = vcmask 261120   ;;  %s1195_s0 = inlined_call_operand.vmem [shape: bf16[64,64], index: 0, kind: input, shape index: {}]   ;;  %s1196_s1 = inlined_call_operand.vmem [shape: bf16[8,16], index: 1, kind: input, shape index: {}]   ;;  %s1197_s2 = inlined_call_operand.vmem [shape: f32[8,32], index: 2, kind: input, shape index: {}, may-alias: {2,14}]   ;;  %s1198_s3 = inlined_call_operand.vmem [shape: f32[8,32], index: 3, kind: input, shape index: {}, may-alias: {3,15}]   ;;  %s1199_s4 = inlined_call_operand.vmem [shape: bf16[32,1], index: 4, kind: input, shape index: {}]   ;;  %s1200_s5 = inlined_call_operand.vmem [shape: bf16[64,1], index: 5, kind: input, shape index: {}]   ;;  %s1201_s6 = inlined_call_operand.<no memory space> [shape: f32[1], index: 6, kind: input, shape index: {}]   ;;  %s1202_s7 = inlined_call_operand.vmem [shape: bf16[64,128], index: 7, kind: input, shape index: {}]   ;;  %s1203_s8 = inlined_call_operand.vmem [shape: bf16[16,128], index: 8, kind: input, shape index: {}]   ;;  %s1204_s9 = inlined_call_operand.vmem [shape: bf16[32,128], index: 9, kind: input, shape index: {}]   ;;  %s1205_s10 = inlined_call_operand.vmem [shape: f32[1,128], index: 10, kind: input, shape index: {}]   ;;  %s1206_s11 = inlined_call_operand.vmem [shape: bf16[32,128], index: 11, kind: input, shape index: {}]   ;;  %s1207_s12 = inlined_call_operand.vmem [shape: f32[1,128], index: 12, kind: input, shape index: {}]   ;;  %s1208_s13 = inlined_call_operand.hbm [shape: f32[8,128], index: 13, kind: output, shape index: {0}]   ;;  %s1209_s14 = inlined_call_operand.vmem [shape: f32[8,32], index: 14, kind: output, shape index: {1}, may-alias: {2,14}]   ;;  %s1210_s15 = inlined_call_operand.vmem [shape: f32[8,32], index: 15, kind: output, shape index: {2}, may-alias: {3,15}]  }
   0x1   :  { %v859_v0 = vld [vmem:[%s1200_s5] sm:$0xff]   ;;  %v860_v1 = vld [vmem:[%s1200_s5 + $0x8] sm:$0xff]   ;;  %808 = vmatprep.subr.bf16.mxu1 %v932_v2  ;;  %812 = vmatprep.mubr.msk.bf16.mxu1 %vm933_vm0, %v932_v2  ;;  %v861_v4 = vld [vmem:[%s1200_s5 + $0x10] sm:$0xff]  }
   0x2   :  { %792 = vmatprep.subr.bf16.mxu0 %v859_v0  ;;  %v862_v3 = vld [vmem:[%s1199_s4] sm:$0xff]   ;;  %v864_v5 = vld [vmem:[%s1199_s4 + $0x8] sm:$0xff]   ;;  %v863_v8 = vld [vmem:[%s1200_s5 + $0x18] sm:$0xff]  }
   0x3   :  { %793 = vmatpush3.bf16.msra.mxu0 %v859_v0  ;;  %809 = vmatpush3.bf16.msra.mxu1 %v862_v3  ;;  %v1041_v6 = vld [vmem:[%s1195_s0] sm:$0xff]   ;;  %v1056_v10 = vld [vmem:[%s1195_s0 + $0x8] sm:$0xff]   ;;  %v1061_v11 = vld [vmem:[%s1195_s0 + $0x10] sm:$0xff]  }
   0x4   :  { %794 = vmatprep.subr.bf16.mxu0 %v860_v1  ;;  %810 = vmatprep.subr.bf16.mxu1 %v932_v2  ;;  %v59_v7 = vld [vmem:[%s1197_s2] sm:$0xff] }
   0x5   :  { %v1049_v9 = vpack.c.bf16 %v59_v7, %v59_v7  ;;  %800 = vmatprep.mubr.msk.bf16.mxu0 %vm114_vm1, %v1041_v6 }
   0x7   :  { %795 = vmatpush3.bf16.msra.mxu0 %v860_v1  ;;  %811 = vmatpush3.bf16.msra.mxu1 %v864_v5 }
   0x8   :  { %796 = vmatprep.subr.bf16.mxu0 %v861_v4  ;;  %816 = vmatprep.subr.bf16.mxu1 %v932_v2 }
   0xa   :  { %813 = vmatmul.mubr.msk.bf16.vlgmr.msra.gmra.mrb[0].mxu1 %vm208_vm2, %v1049_v9 }
   0xb   :  { %797 = vmatpush3.bf16.msra.mxu0 %v861_v4  ;;  %818 = vmatprep.mubr.msk.bf16.mxu1 %vm933_vm0, %v932_v2 }
   0xc   :  { %798 = vmatprep.subr.bf16.mxu0 %v863_v8 }
   0xd   :  { %22 = vsyncpa [#allocation4], 0  ;;  %v1076_v12 = vld [vmem:[%s1195_s0 + $0x18] sm:$0xff]   ;;  %v934_v13 = vmov 0   ;;  %v261_v25 = vstv %s1201_s6  ;;  %vm278_vm3 = vcmask 7168   ;;  %vm430_vm4 = vcmask 130048  }
   0xe   :  { %858 = vset.pattern.permute.xlu1 %v934_v13  ;;  %857 = vset.pattern.permute.xlu0 %v934_v13  ;;  %s935_s5 = smov 32   ;;  %s937_s6 = smov 96  }
   0xf   :  { %799 = vmatpush3.bf16.msra.mxu0 %v863_v8  ;;  %s938_s28 = smov [#allocation3]  }
  0x10   :  { %822 = vmatprep.subr.bf16.mxu0 %v932_v2  ;;  %s721_s29 = sshll.u32 %s938_s28, 4  ;;  %s722_s29 = int_to_ptr.vmem [resolvable:$true] %s721_s29 }
  0x11   :  { %p913_p1 = scmp.lt.s32.totalorder %s722_s29, %s722_s29 }
  0x12   :  { %801 = vmatmul.mubr.msk.bf16.vlgmr.msra.gmra.mrb[0].mxu0 %vm114_vm1, %v1056_v10 }
  0x13   :  { %804 = vmatprep.mubr.msk.bf16.mxu0 %vm114_vm1, %v1061_v11 }
  0x1a   :  { %805 = vmatmul.mubr.msk.bf16.gmra.mrb[4].mxu0 %vm114_vm1, %v1076_v12 }
  0x1b   :  { %830 = vmatprep.mubr.msk.bf16.mxu0 %vm933_vm0, %v932_v2 }
  0xdd   :  { %v246_v14 = vpop.f32.mrb[0].mxu1 }
  0xde   :  { %v814_v15 = vpop.f32.mrb[1].mxu1 }
  0xdf   :  { %v249_v16 = vpop.f32.mrb[2].mxu1 }
  0xe0   :  { %v815_v17 = vpop.f32.mrb[3].mxu1 }
  0xe5   :  { %v802_v18 = vpop.f32.mrb[0].mxu0 }
  0xe6   :  { %v161_v19 = vpop.f32.mrb[1].mxu0  ;;  %v254_v20 = vadd.f32 %v802_v18, %v246_v14 }
  0xe7   :  { %v252_v21 = vadd.f32 %v246_v14, %v161_v19  ;;  %v803_v22 = vpop.f32.mrb[2].mxu0 }
  0xe8   :  { %v255_v23 = vadd.f32 %v803_v22, %v246_v14  ;;  %v164_v24 = vpop.f32.mrb[3].mxu0  ;;  %v264_v27 = vadd.f32 %v261_v25, %v254_v20 }
  0xe9   :  { %v253_v26 = vadd.f32 %v246_v14, %v164_v24  ;;  %v262_v28 = vadd.f32 %v261_v25, %v252_v21 }
  0xea   :  { %v265_v30 = vadd.f32 %v261_v25, %v255_v23  ;;  %v272_v37 = vmax.f32 %v264_v27, 0.0 }
  0xeb   :  { %v263_v33 = vadd.f32 %v261_v25, %v253_v26  ;;  %v270_v40 = vmax.f32 %v262_v28, 0.0 }
  0xec   :  { %v273_v43 = vmax.f32 %v265_v30, 0.0  ;;  %v281_v49 = vsel %vm278_vm3, %v272_v37, -inf }
  0xed   :  { %v806_v29 = vpop.f32.mrb[4].mxu0  ;;  %v271_v46 = vmax.f32 %v263_v33, 0.0  ;;  %v279_v52 = vsel %vm278_vm3, %v270_v40, -inf }
  0xee   :  { %v258_v31 = vadd.f32 %v806_v29, %v246_v14  ;;  %v177_v32 = vpop.f32.mrb[5].mxu0  ;;  %v282_v56 = vsel %vm278_vm3, %v273_v43, -inf }
  0xef   :  { %v256_v34 = vadd.f32 %v246_v14, %v177_v32  ;;  %v807_v35 = vpop.f32.mrb[6].mxu0  ;;  %v280_v59 = vsel %vm278_vm3, %v271_v46, -inf }
  0xf0   :  { %v268_v36 = vadd.f32 %v261_v25, %v258_v31  ;;  %v259_v38 = vadd.f32 %v807_v35, %v246_v14  ;;  %v180_v39 = vpop.f32.mrb[7].mxu0 }
  0xf1   :  { %v266_v41 = vadd.f32 %v261_v25, %v256_v34  ;;  %v257_v42 = vadd.f32 %v246_v14, %v180_v39 }
  0xf2   :  { %v276_v44 = vmax.f32 %v268_v36, 0.0  ;;  %v269_v45 = vadd.f32 %v261_v25, %v259_v38 }
  0xf3   :  { %v274_v47 = vmax.f32 %v266_v41, 0.0  ;;  %v267_v48 = vadd.f32 %v261_v25, %v257_v42 }
  0xf4   :  { %v287_v50 = vsel %vm278_vm3, %v276_v44, -inf  ;;  %v277_v51 = vmax.f32 %v269_v45, 0.0 }
  0xf5   :  { %v288_v53 = vmax.f32 %v281_v49, %v287_v50  ;;  %v283_v54 = vsel %vm278_vm3, %v274_v47, -inf  ;;  %v275_v55 = vmax.f32 %v267_v48, 0.0 }
  0xf6   :  { %v284_v57 = vmax.f32 %v279_v52, %v283_v54  ;;  %v289_v58 = vsel %vm278_vm3, %v277_v51, -inf }
  0xf7   :  { %v290_v60 = vmax.f32 %v282_v56, %v289_v58  ;;  %v285_v61 = vsel %vm278_vm3, %v275_v55, -inf  ;;  %v869_v56 = vld [vmem:[%s1202_s7] sm:$0xff]   ;;  %v871_v58 = vld [vmem:[%s1202_s7 + $0x8] sm:$0xff]  }
  0xf8   :  { %v286_v62 = vmax.f32 %v280_v59, %v285_v61  ;;  %823 = vmatpush3.bf16.msra.mxu0 %v869_v56  ;;  %v58_v59 = vld [vmem:[%s1196_s1] sm:$0xf]  ;;  %v872_v61 = vld [vmem:[%s1202_s7 + $0x10] sm:$0xff]  }
  0xf9   :  { %v292_v63 = vmax.f32 %v288_v53, %v290_v60  ;;  %824 = vmatprep.subr.bf16.mxu0 %v932_v2  ;;  %v873_v60 = vld [vmem:[%s1204_s9] sm:$0xff]  }
  0xfa   :  { %v291_v0 = vmax.f32 %v284_v57, %v286_v62  ;;  %v870_v57 = vld [vmem:[%s1203_s8] sm:$0xff]   ;;  %v875_v62 = vld [vmem:[%s1204_s9 + $0x8] sm:$0xff]   ;;  %s936_s9 = smov 64  }
  0xfb   :  { %817 = vmatpush3.bf16.msra.mxu1 %v870_v57 }
  0xfc   :  { %v293_v1 = vmax.f32 %v291_v0, %v292_v63  ;;  %825 = vmatpush3.bf16.msra.mxu0 %v871_v58  ;;  %834 = vmatprep.subr.bf16.mxu1 %v932_v2  ;;  %v874_v63 = vld [vmem:[%s1202_s7 + $0x18] sm:$0xff]   ;;  %v60_v0 = vld [vmem:[%s1198_s3] sm:$0xff] }
  0xfd   :  { %826 = vmatprep.subr.bf16.mxu0 %v932_v2 }
  0xfe   :  { %v299_v3 = vsub.f32 %v275_v55, %v293_v1  ;;  %v300_v4 = vsub.f32 %v276_v44, %v293_v1  ;;  %v301_v5 = vsub.f32 %v277_v51, %v293_v1  ;;  %v294_v7 = vsub.f32 %v270_v40, %v293_v1  ;;  %819 = vmatmul.mubr.msk.bf16.vlgmr.msra.gmra.mrb[4].mxu1 %vm430_vm4, %v58_v59 }
  0xff   :  { %v295_v8 = vsub.f32 %v271_v46, %v293_v1  ;;  %v296_v13 = vsub.f32 %v272_v37, %v293_v1  ;;  %v297_v14 = vsub.f32 %v273_v43, %v293_v1  ;;  %v298_v15 = vsub.f32 %v274_v47, %v293_v1  ;;  %835 = vmatpush3.bf16.msra.mxu1 %v873_v60 }
 0x100   :  { %v302_v16 = vmul.f32 1.442695, %v294_v7  ;;  %v312_v21 = vmul.f32 1.442695, %v299_v3  ;;  %v314_v22 = vmul.f32 1.442695, %v300_v4  ;;  %838 = vmatprep.mubr.msk.bf16.mxu1 %vm933_vm0, %v932_v2  ;;  %827 = vmatpush3.bf16.msra.mxu0 %v872_v61  ;;  %v342_v1 = vunpack.c.l.bf16 %v1041_v6 }
 0x101   :  { %v304_v17 = vmul.f32 1.442695, %v295_v8  ;;  %v306_v18 = vmul.f32 1.442695, %v296_v13  ;;  %v308_v19 = vmul.f32 1.442695, %v297_v14  ;;  %836 = vmatprep.subr.bf16.mxu1 %v932_v2  ;;  %828 = vmatprep.subr.bf16.mxu0 %v932_v2  ;;  %v343_v7 = vunpack.c.h.bf16 %v1041_v6 }
 0x102   :  { %882 = vpow2.f32 %v302_v16  ;;  %v310_v20 = vmul.f32 1.442695, %v298_v15  ;;  %v316_v23 = vmul.f32 1.442695, %v301_v5  ;;  %v344_v5 = vunpack.c.l.bf16 %v1056_v10 }
 0x103   :  { %884 = vpow2.f32 %v304_v17  ;;  %837 = vmatpush3.bf16.msra.mxu1 %v875_v62  ;;  %v345_v13 = vunpack.c.h.bf16 %v1056_v10  ;;  %v348_v10 = vunpack.c.l.bf16 %v1076_v12 }
 0x104   :  { %886 = vpow2.f32 %v306_v18  ;;  %829 = vmatpush3.bf16.msra.mxu0 %v874_v63  ;;  %842 = vmatprep.subr.bf16.mxu1 %v932_v2 }
 0x105   :  { %888 = vpow2.f32 %v308_v19 }
 0x106   :  { %890 = vpow2.f32 %v310_v20  ;;  %839 = vmatmul.mubr.msk.bf16.vlgmr.msra.gmra.mrb[8].mxu1 %vm208_vm2, %v1049_v9  ;;  %v346_v9 = vunpack.c.l.bf16 %v1061_v11 }
 0x107   :  { %892 = vpow2.f32 %v312_v21  ;;  %846 = vmatprep.mubr.msk.bf16.mxu1 %vm933_vm0, %v932_v2  ;;  %v347_v21 = vunpack.c.h.bf16 %v1061_v11 }
 0x108   :  { %894 = vpow2.f32 %v314_v22 }
 0x109   :  { %896 = vpow2.f32 %v316_v23 }
 0x10c   :  { %v883_v24 = vpop.eup %882 }
 0x10d   :  { %v885_v25 = vpop.eup %884  ;;  %v318_v26 = vsel %vm278_vm3, %v883_v24, 0.0 }
 0x10e   :  { %v887_v27 = vpop.eup %886  ;;  %v319_v28 = vsel %vm278_vm3, %v885_v25, 0.0 }
 0x10f   :  { %v889_v29 = vpop.eup %888  ;;  %v320_v30 = vadd.f32 %v319_v28, %v318_v26  ;;  %v321_v31 = vsel %vm278_vm3, %v887_v27, 0.0 }
 0x110   :  { %v891_v32 = vpop.eup %890  ;;  %v323_v34 = vsel %vm278_vm3, %v889_v29, 0.0 }
 0x111   :  { %v322_v33 = vadd.f32 %v321_v31, %v320_v30  ;;  %v893_v35 = vpop.eup %892  ;;  %v325_v37 = vsel %vm278_vm3, %v891_v32, 0.0 }
 0x112   :  { %v895_v38 = vpop.eup %894  ;;  %v327_v40 = vsel %vm278_vm3, %v893_v35, 0.0 }
 0x113   :  { %v324_v36 = vadd.f32 %v323_v34, %v322_v33  ;;  %v897_v41 = vpop.eup %896  ;;  %v329_v43 = vsel %vm278_vm3, %v895_v38, 0.0 }
 0x114   :  { %v331_v45 = vsel %vm278_vm3, %v897_v41, 0.0 }
 0x115   :  { %v326_v39 = vadd.f32 %v325_v37, %v324_v36 }
 0x117   :  { %v328_v42 = vadd.f32 %v327_v40, %v326_v39 }
 0x119   :  { %v330_v44 = vadd.f32 %v329_v43, %v328_v42 }
 0x11b   :  { %v332_v46 = vadd.f32 %v331_v45, %v330_v44 }
 0x11d   :  { %898 = vrcp.f32 %v332_v46 }
 0x127   :  { %v899_v47 = vpop.eup %898 }
 0x128   :  { %v336_v48 = vmul.f32 %v899_v47, %v887_v27  ;;  %v334_v49 = vmul.f32 %v899_v47, %v883_v24  ;;  %v337_v50 = vmul.f32 %v899_v47, %v889_v29  ;;  %v335_v51 = vmul.f32 %v899_v47, %v885_v25 }
 0x129   :  { %v339_v52 = vmul.f32 %v899_v47, %v893_v35  ;;  %v338_v53 = vmul.f32 %v899_v47, %v891_v32  ;;  %v341_v54 = vmul.f32 %v899_v47, %v897_v41  ;;  %v340_v55 = vmul.f32 %v899_v47, %v895_v38 }
 0x12a   :  { %362 = vperm.xlu1 %858, %v336_v48   ;;  %352 = vperm.xlu0 %857, %v334_v49   ;;  %v349_v29 = vunpack.c.h.bf16 %v1076_v12 }
 0x12e   :  { %367 = vperm.xlu1 %858, %v337_v50   ;;  %357 = vperm.xlu0 %857, %v335_v51  }
 0x132   :  { %377 = vperm.xlu1 %858, %v339_v52   ;;  %372 = vperm.xlu0 %857, %v338_v53   ;;  %v762_v53 = vld [vmem:[%s1205_s10] ss:$0 sm:$0xff] }
 0x136   :  { %387 = vperm.xlu1 %858, %v341_v54   ;;  %382 = vperm.xlu0 %857, %v340_v55  }
 0x13a   :  { %614 = vrot.lane.b32.xlu1 %v60_v0, %s935_s5 }
 0x1a9   :  { %v363_v3 = vpop.permute.xlu1 %362  ;;  %v353_v4 = vpop.permute.xlu0 %352 }
 0x1aa   :  { %v390_v8 = vmul.f32 %v353_v4, %v342_v1  ;;  %v392_v16 = vmul.f32 %v363_v3, %v344_v5 }
 0x1ac   :  { %v398_v18 = vsel %vm114_vm1, %v390_v8, 0.0  ;;  %v401_v6 = vsel %vm114_vm1, %v392_v16, 0.0  ;;  %v877_v8 = vld [vmem:[%s1206_s11 + $0x8] sm:$0xff]  }
 0x1ad   :  { %v368_v14 = vpop.permute.xlu1 %367  ;;  %v358_v15 = vpop.permute.xlu0 %357 }
 0x1ae   :  { %v391_v17 = vmul.f32 %v358_v15, %v343_v7  ;;  %v393_v19 = vmul.f32 %v368_v14, %v345_v13  ;;  %v876_v7 = vld [vmem:[%s1206_s11] sm:$0xff]  }
 0x1af   :  { %843 = vmatpush3.bf16.msra.mxu1 %v876_v7 }
 0x1b0   :  { %v399_v20 = vsel %vm114_vm1, %v391_v17, 0.0  ;;  %v403_v27 = vsel %vm114_vm1, %v393_v19, 0.0  ;;  %844 = vmatprep.subr.bf16.mxu1 %v932_v2 }
 0x1b1   :  { %v400_v22 = vadd.f32 %v399_v20, %v398_v18  ;;  %v378_v23 = vpop.permute.xlu1 %377  ;;  %v373_v24 = vpop.permute.xlu0 %372  ;;  %v764_v18 = vld [vmem:[%s1207_s12] ss:$0 sm:$0xff] }
 0x1b2   :  { %v394_v25 = vmul.f32 %v373_v24, %v346_v9  ;;  %v395_v28 = vmul.f32 %v378_v23, %v347_v21 }
 0x1b3   :  { %v402_v26 = vadd.f32 %v401_v6, %v400_v22  ;;  %845 = vmatpush3.bf16.msra.mxu1 %v877_v8 }
 0x1b4   :  { %v405_v33 = vsel %vm114_vm1, %v394_v25, 0.0  ;;  %v407_v35 = vsel %vm114_vm1, %v395_v28, 0.0 }
 0x1b5   :  { %v404_v30 = vadd.f32 %v403_v27, %v402_v26  ;;  %v388_v31 = vpop.permute.xlu1 %387  ;;  %v383_v32 = vpop.permute.xlu0 %382 }
 0x1b6   :  { %v396_v11 = vmul.f32 %v383_v32, %v348_v10  ;;  %v397_v36 = vmul.f32 %v388_v31, %v349_v29 }
 0x1b7   :  { %v406_v34 = vadd.f32 %v405_v33, %v404_v30 }
 0x1b8   :  { %v409_v38 = vsel %vm114_vm1, %v396_v11, 0.0  ;;  %v411_v40 = vsel %vm114_vm1, %v397_v36, 0.0 }
 0x1b9   :  { %v408_v37 = vadd.f32 %v407_v35, %v406_v34  ;;  %v615_v1 = vpop.permute.xlu1 %614 }
 0x1bb   :  { %v410_v39 = vadd.f32 %v409_v38, %v408_v37 }
 0x1bd   :  { %v412_v41 = vadd.f32 %v411_v40, %v410_v39 }
 0x1bf   :  { %v413_v42 = vpack.c.bf16 %v412_v41, %v412_v41 }
 0x1c1   :  { %831 = vmatmul.mubr.msk.bf16.vlgmr.msra.gmra.mrb[8].mxu0 %vm114_vm1, %v413_v42 }
 0x1d1   :  { %v468_v12 = vpop.f32.mrb[4].mxu1 }
 0x1d2   :  { %v820_v43 = vpop.f32.mrb[5].mxu1 }
 0x1d3   :  { %v471_v44 = vpop.f32.mrb[6].mxu1 }
 0x1d4   :  { %v821_v45 = vpop.f32.mrb[7].mxu1 }
 0x1d9   :  { %v591_v46 = vpop.f32.mrb[8].mxu1 }
 0x1da   :  { %v840_v47 = vpop.f32.mrb[9].mxu1 }
 0x1db   :  { %v594_v48 = vpop.f32.mrb[10].mxu1 }
 0x1dc   :  { %v841_v49 = vpop.f32.mrb[11].mxu1 }
 0x294   :  { %v535_v50 = vpop.f32.mrb[8].mxu0 }
 0x295   :  { %v536_v51 = vadd.f32 %v535_v50, %v468_v12  ;;  %v832_v52 = vpop.f32.mrb[9].mxu0 }
 0x296   :  { %v538_v54 = vpop.f32.mrb[10].mxu0 }
 0x297   :  { %v597_v55 = vadd.f32 %v591_v46, %v536_v51  ;;  %v833_v56 = vpop.f32.mrb[11].mxu0 }
 0x299   :  { %v605_v57 = vadd.f32 %v762_v53, %v597_v55 }
 0x29b   :  { %900 = vtanh.f32 %v605_v57  ;;  %v763_v59 = vmul.f32 -1.442695, %v605_v57 }
 0x29d   :  { %902 = vpow2.f32 %v763_v59 }
 0x2a5   :  { %v901_v58 = vpop.eup %900 }
 0x2a6   :  { %619 = vrot.lane.b32.xlu0 %v901_v58, %s936_s9 }
 0x2a7   :  { %v903_v60 = vpop.eup %902 }
 0x2a8   :  { %v609_v61 = vadd.f32 1.0, %v903_v60 }
 0x2aa   :  { %904 = vrcp.f32 %v609_v61 }
 0x2b4   :  { %v905_v62 = vpop.eup %904 }
 0x2b5   :  { %v617_v3 = vmul.f32 %v905_v62, %v615_v1 }
 0x318   :  { %v620_v63 = vpop.permute.xlu0 %619 }
 0x319   :  { %v622_v0 = vmul.f32 %v905_v62, %v620_v63 }
 0x31b   :  { %624 = vrot.lane.b32.xlu0 %v622_v0, %s935_s5 }
 0x38d   :  { %v625_v4 = vpop.permute.xlu0 %624 }
 0x38e   :  { %v627_v5 = vadd.f32 %v625_v4, %v617_v3 }
 0x390   :  { %906 = vtanh.f32 %v627_v5 }
 0x39a   :  { %v907_v13 = vpop.eup %906 }
 0x39b   :  { %630 = vrot.lane.b32.xlu1 %v907_v13, %s936_s9 }
 0x40d   :  { %v631_v14 = vpop.permute.xlu1 %630 }
 0x40e   :  { %v633_v15 = vmul.f32 %v905_v62, %v631_v14 }
 0x410   :  { %v644_v16 = vpack.c.bf16 %v633_v15, %v633_v15  ;;  %635 = vrot.lane.b32.xlu1 %v633_v15, %s935_s5 }
 0x412   :  { %657 = vrot.lane.b32.xlu0 %v644_v16, %s935_s5 }
 0x416   :  { %640 = vrot.lane.b32.xlu0 %v627_v5, %s937_s6 }
 0x482   :  { %v636_v17 = vpop.permute.xlu1 %635 }
 0x483   :  { %638 = vst.msk [vmem:[%s1209_s14] sm:$0xff] %vm208_vm2, %v636_v17  ;;  %s908_s14 = scalar_lea.vmem %s722_s29, 128 }
 0x484   :  { %v658_v9 = vpop.permute.xlu0 %657  ;;  %p909_p0 = scmp.ne.s32.totalorder %s722_s29, %s908_s14  ;;  %p914_p2 = scmp.lt.s32.totalorder %s908_s14, %s908_s14 }
 0x485   :  { %847 = vmatmul.mubr.msk.bf16.vlgmr.msra.gmra.mrb[12].mxu1 %vm208_vm2, %v658_v9 }
 0x486   :  { %p915_p3 = por %p914_p2, %p913_p1 }
 0x488   :  { %v641_v2 = vpop.permute.xlu0 %640  ;;  %p916_p4 = pnand %p915_p3, %p909_p0 }
 0x489   :  { %643 = vst.msk [vmem:[%s1210_s15] sm:$0xff] %vm208_vm2, %v641_v2 }
 0x558   :  { %v708_v19 = vpop.f32.mrb[12].mxu1 }
 0x559   :  { %v709_v20 = vadd.f32 %v764_v18, %v708_v19  ;;  %v848_v21 = vpop.f32.mrb[13].mxu1 }
 0x55a   :  { %v711_v22 = vpop.f32.mrb[14].mxu1 }
 0x55b   :  { %714 = vst [vmem:[#allocation3] sm:$0xff] %v709_v20  ;;  %v849_v23 = vpop.f32.mrb[15].mxu1 }
 0x55c   :  { %919 = shalt.err (!%p916_p4)
}
 0x55d   :  { %s920_s12 = scalar_lea.hbm %s1208_s13, 128 }
 0x55e   :  { %p921_p5 = scmp.ne.s32.totalorder %s1208_s13, %s920_s12  ;;  %p924_p6 = scmp.lt.u32.totalorder %s920_s12, %s1208_s13 }
 0x560   :  { %p926_p7 = pnand %p924_p6, %p921_p5 }
 0x562   :  { %929 = shalt.err (!%p926_p7)
}
 0x563   :  { %724 = dma.vmem_to_hbm [thread:$0]  %s722_s29, 128, %s1208_s13, [#allocation4]  }
 0x564   :  { %930 = dma.done.wait [#allocation4], 128  }
 0x565   :  { %931 = vsyncadd [#allocation4], 4294967168 }
 0x566   :  { %736 = vsyncpa [#allocation4], 1 }

</bundles_post_ra>
